<compile_context>
chip_gen: v6e
topology: v6e:2x2x1
jax: 0.10.0
libtpu: 0.0.40
codegen_flags: <defaults>
</compile_context>

<pallas_src>
import functools

import jax
import jax.numpy as jnp
from jax.experimental import pallas as pl
from jax.experimental.pallas import tpu as pltpu

ALPHA = 0.25
GAMMA = 2.0

MAX_TILE_ROWS = 2048          # (2048, 512) f32 tile = 4 MiB per input block
VMEM_LIMIT_BYTES = 32 * 1024 * 1024


def _round_up(x, m):
    return ((x + m - 1) // m) * m


def _default_num_partials():
    # v7x has 2 TensorCores per chip; v5e/v6e have 1.  Best-effort query with a
    # safe fallback (an extra serial partial is harmless on single-TC chips).
    try:
        info = pltpu.get_tpu_info()
        for attr in ("num_cores", "core_count", "num_tensorcores", "tensorcore_count"):
            n = getattr(info, attr, None)
            if n is None:
                continue
            n = int(n)
            if 1 <= n <= 8:
                return n
    except Exception:
        pass
    return 2


def focal_loss_kernel(pred_ref, label_ref, out_ref, acc_ref, *,
                      gamma, binary_labels, rows_valid, tile_rows, ragged):
    step = pl.program_id(1)

    @pl.when(step == 0)
    def _():
        acc_ref[...] = jnp.zeros_like(acc_ref)

    x = pred_ref[...].astype(jnp.float32)
    y = label_ref[...].astype(jnp.float32)

    if binary_labels:
        # For y in {0,1}: pt == p*y + (1-p)*(1-y) == sigmoid(x*(2y-1)) and
        # BCE == -log(max(pt, 1e-12)) (same clamp as the reference).  One exp,
        # one approx reciprocal (EUP vrcp) and one log per element — no
        # full-precision divide, minimal EUP pressure (relevant on v5e).
        z = x * (2.0 * y - 1.0)
        t = jnp.minimum(jnp.exp(-z), 1e30)        # clamp avoids inf/inf -> NaN
        pt = pl.reciprocal(1.0 + t, approx=True)  # == sigmoid(z)
        bce = -jnp.log(jnp.maximum(pt, 1e-12))
    else:
        # General (soft-label) path: verbatim reference formula.
        p = jax.nn.sigmoid(x)
        bce = -(y * jnp.log(jnp.maximum(p, 1e-12))
                + (1.0 - y) * jnp.log(jnp.maximum(1.0 - p, 1e-12)))
        pt = p * y + (1.0 - p) * (1.0 - y)

    one_minus_pt = 1.0 - pt
    if gamma == 2.0:
        modulator = one_minus_pt * one_minus_pt   # VPU mul, not pow (= exp+log on EUP)
    else:
        modulator = one_minus_pt ** gamma

    term = modulator * bce

    if ragged:
        # Mask the garbage rows of the (only) partial boundary block.
        block_id = pl.program_id(0) * pl.num_programs(1) + step
        row0 = block_id * tile_rows
        row_ids = row0 + jax.lax.broadcasted_iota(jnp.int32, term.shape, 0)
        term = jnp.where(row_ids < rows_valid, term, 0.0)

    # Sublane row-group reduction into a small (8, LANES) accumulator: the
    # reshape is layout-compatible (splits the sublane axis by 8) and the sum
    # over the leading axis is a chain of pure VPU adds — no XLU, no per-step
    # full-tile accumulator store.
    acc_ref[...] += jnp.sum(term.reshape(-1, 8, term.shape[-1]), axis=0)

    @pl.when(step == pl.num_programs(1) - 1)
    def _():
        # Single cross-lane/sublane reduction per partial, only at the very end.
        partial = jnp.sum(acc_ref[...])
        out_ref[...] = jnp.full(out_ref.shape, partial, dtype=jnp.float32)


def focal_loss(prediction, label, alpha=ALPHA, gamma=GAMMA, *,
               binary_labels=True, max_tile_rows=MAX_TILE_ROWS,
               num_partials=None):
    """Segmentation focal loss for NCHW prediction logits.

    binary_labels=True assumes labels take values in {0,1}; for soft labels use
    binary_labels=False (exact reference BCE formula).
    """
    N, C, H, W = prediction.shape
    denom = float(N * H * W)            # .sum(dim=1).mean() == full sum / (N*H*W)
    total = N * C * H * W

    P = num_partials if num_partials is not None else _default_num_partials()
    P = max(1, int(P))

    # ---- lane-dense 2D view; avoid jnp.pad whenever possible --------------
    lanes = None
    if total >= 8 * 128:
        for cand in (512, 256, 128):
            if total % cand == 0 and (total // cand) >= 8:
                lanes = cand
                break

    pred_flat = prediction.reshape(-1)
    label_flat = label.reshape(-1)          # native dtype: no extra HBM cast pass

    if lanes is not None:
        rows = total // lanes
        pad = 0
    else:
        # Fallback for awkward/tiny shapes only.  Padding chosen so padded
        # elements contribute *exactly* zero loss: logit +40 with label 1
        # -> pt == 1, bce == 0, (1 - pt)^gamma == 0.
        lanes = 128
        rows = _round_up(pl.cdiv(total, lanes), 8)
        pad = rows * lanes - total
        pred_flat = jnp.pad(pred_flat, (0, pad), constant_values=40.0)
        label_flat = jnp.pad(label_flat, (0, pad), constant_values=1.0)

    pred2d = pred_flat.reshape(rows, lanes)
    label2d = label_flat.reshape(rows, lanes)

    # ---- tiling ------------------------------------------------------------
    # tile_rows: multiple of 8 (sublane rule), never larger than the array's
    # row count (so only the standard partial boundary block can occur), capped
    # so one f32 input block is <= 4 MiB.
    tile_rows = min(max_tile_rows,
                    _round_up(pl.cdiv(rows, P), 8),
                    (rows // 8) * 8)
    num_blocks = pl.cdiv(rows, tile_rows)
    # Use the partial (megacore) axis only when it divides the block count so
    # every generated block index is in range.
    P_eff = P if (P > 1 and num_blocks % P == 0) else 1
    steps = num_blocks // P_eff
    ragged = (num_blocks * tile_rows != rows)

    kernel = functools.partial(
        focal_loss_kernel, gamma=gamma, binary_labels=binary_labels,
        rows_valid=rows, tile_rows=tile_rows, ragged=ragged)

    index_map = lambda c, i: (c * steps + i, 0)

    partials = pl.pallas_call(
        kernel,
        out_shape=jax.ShapeDtypeStruct((P_eff, 8, 128), jnp.float32),
        grid_spec=pltpu.PrefetchScalarGridSpec(
            num_scalar_prefetch=0,
            grid=(P_eff, steps),
            in_specs=[
                pl.BlockSpec((tile_rows, lanes), index_map),
                pl.BlockSpec((tile_rows, lanes), index_map),
            ],
            out_specs=pl.BlockSpec((1, 8, 128), lambda c, i: (c, 0, 0)),
            scratch_shapes=[pltpu.VMEM((8, lanes), jnp.float32)],
        ),
        compiler_params=pltpu.CompilerParams(
            dimension_semantics=("parallel", "arbitrary"),
            vmem_limit_bytes=VMEM_LIMIT_BYTES,
        ),
    )(pred2d, label2d)

    # Each partial sum is broadcast over its (8,128) output tile; take one lane
    # per partial. alpha and the mean divisor fold into one scalar multiply.
    return jnp.sum(partials[:, 0, 0]) * (alpha / denom)


def focal_loss_ref(prediction, label, alpha=ALPHA, gamma=GAMMA):
    p = jax.nn.sigmoid(prediction.astype(jnp.float32))
    y = label.astype(jnp.float32)
    bce = -(y * jnp.log(jnp.maximum(p, 1e-12))
            + (1.0 - y) * jnp.log(jnp.maximum(1.0 - p, 1e-12)))
    ff = p * y + (1.0 - p) * (1.0 - y)
    return jnp.mean(jnp.sum((1.0 - ff) ** gamma * bce * alpha, axis=1))


if __name__ == "__main__":
    key = jax.random.PRNGKey(0)
    k1, k2, k3, k4 = jax.random.split(key, 4)

    # Case 1: small NCHW — exercises the free-reshape (no-pad) path.
    N, C, H, W = 2, 4, 16, 16
    pred1 = jax.random.normal(k1, (N, C, H, W), dtype=jnp.float32)
    lab1 = (jax.random.uniform(k2, (N, C, H, W)) > 0.5).astype(jnp.float32)
    ref1 = focal_loss_ref(pred1, lab1)
    out1 = jax.block_until_ready(focal_loss(pred1, lab1))
    assert jnp.allclose(out1, ref1, rtol=2e-3, atol=1e-6), (out1, ref1)

    # General (soft-label capable) path: exact reference formula.
    out1g = jax.block_until_ready(focal_loss(pred1, lab1, binary_labels=False))
    assert jnp.allclose(out1g, ref1, rtol=1e-5, atol=1e-6), (out1g, ref1)

    # Case 2: larger tensor — multi-block grid, ragged last block (in-kernel
    # tail masking) and, on 2-TC chips, the parallel partial split.
    N2, C2, H2, W2 = 2, 3, 40, 128
    pred2 = jax.random.normal(k3, (N2, C2, H2, W2), dtype=jnp.float32)
    lab2 = (jax.random.uniform(k4, (N2, C2, H2, W2)) > 0.5).astype(jnp.float32)
    ref2 = focal_loss_ref(pred2, lab2)
    out2 = jax.block_until_ready(focal_loss(pred2, lab2))
    assert jnp.allclose(out2, ref2, rtol=2e-3, atol=1e-6), (out2, ref2)

    # Case 3: awkward size -> padded fallback path.
    pred3 = jax.random.normal(k1, (2, 3, 5, 7), dtype=jnp.float32)
    lab3 = (jax.random.uniform(k2, (2, 3, 5, 7)) > 0.5).astype(jnp.float32)
    ref3 = focal_loss_ref(pred3, lab3)
    out3 = jax.block_until_ready(focal_loss(pred3, lab3))
    assert jnp.allclose(out3, ref3, rtol=2e-3, atol=1e-6), (out3, ref3)

    print("KERNEL_OK")
</pallas_src>

<mosaic_0001>
module attributes {stable_mosaic.version = 11 : i64} {
  func.func @focal_loss_kernel(%arg0: i32, %arg1: i32, %arg2: memref<8x256xf32, #tpu.memory_space<vmem>>, %arg3: memref<8x256xf32, #tpu.memory_space<vmem>>, %arg4: memref<1x8x128xf32, #tpu.memory_space<vmem>>, %arg5: memref<8x256xf32, #tpu.memory_space<vmem>>) attributes {dimension_semantics = [#tpu.dimension_semantics<parallel>, #tpu.dimension_semantics<arbitrary>], iteration_bounds = array<i64: 1, 1>, scalar_prefetch = 0 : i64, scratch_operands = 1 : i64, tpu.core_type = #tpu.core_type<tc>, window_params = [{transform_indices = @transform_0, window_bounds = array<i64: 8, 256>}, {transform_indices = @transform_1, window_bounds = array<i64: 8, 256>}, {transform_indices = @transform_2, window_bounds = array<i64: 1, 8, 128>}]} {
    %c0_i32 = arith.constant 0 : i32
    %0 = arith.cmpi eq, %arg1, %c0_i32 : i32
    %1 = arith.extui %0 : i1 to i32
    %c0_i32_0 = arith.constant 0 : i32
    %2 = arith.cmpi ne, %1, %c0_i32_0 : i32
    scf.if %2 {
      %cst_18 = arith.constant 0.000000e+00 : f32
      %35 = vector.broadcast %cst_18 : f32 to vector<8x256xf32>
      %c0_19 = arith.constant 0 : index
      %c0_20 = arith.constant 0 : index
      %36 = vector.load %arg5[%c0_19, %c0_20] : memref<8x256xf32, #tpu.memory_space<vmem>>, vector<8x256xf32>
      tpu.vector_store %arg5[%c0_19, %c0_20], %35 {strides = array<i32>} : memref<8x256xf32, #tpu.memory_space<vmem>>, vector<8x256xf32>,
    } else {
    }
    %c0 = arith.constant 0 : index
    %c0_1 = arith.constant 0 : index
    %3 = vector.load %arg2[%c0, %c0_1] : memref<8x256xf32, #tpu.memory_space<vmem>>, vector<8x256xf32>
    %c0_2 = arith.constant 0 : index
    %c0_3 = arith.constant 0 : index
    %4 = vector.load %arg3[%c0_2, %c0_3] : memref<8x256xf32, #tpu.memory_space<vmem>>, vector<8x256xf32>
    %cst = arith.constant 2.000000e+00 : f32
    %5 = vector.broadcast %cst : f32 to vector<8x256xf32>
    %6 = arith.mulf %5, %4 : vector<8x256xf32>
    %cst_4 = arith.constant 1.000000e+00 : f32
    %7 = vector.broadcast %cst_4 : f32 to vector<8x256xf32>
    %8 = arith.subf %6, %7 : vector<8x256xf32>
    %9 = arith.mulf %3, %8 : vector<8x256xf32>
    %cst_5 = arith.constant 0.000000e+00 : f32
    %10 = vector.broadcast %cst_5 : f32 to vector<8x256xf32>
    %11 = arith.subf %10, %9 : vector<8x256xf32>
    %12 = math.exp %11 : vector<8x256xf32>
    %cst_6 = arith.constant 1.000000e+30 : f32
    %13 = vector.broadcast %cst_6 : f32 to vector<8x256xf32>
    %14 = arith.minimumf %12, %13 : vector<8x256xf32>
    %cst_7 = arith.constant 1.000000e+00 : f32
    %15 = vector.broadcast %cst_7 : f32 to vector<8x256xf32>
    %16 = arith.addf %15, %14 : vector<8x256xf32>
    %17 = tpu.reciprocal %16 {approx = true} : vector<8x256xf32> -> vector<8x256xf32>
    %cst_8 = arith.constant 9.99999996E-13 : f32
    %18 = vector.broadcast %cst_8 : f32 to vector<8x256xf32>
    %19 = arith.maximumf %17, %18 : vector<8x256xf32>
    %20 = math.log %19 : vector<8x256xf32>
    %cst_9 = arith.constant 0.000000e+00 : f32
    %21 = vector.broadcast %cst_9 : f32 to vector<8x256xf32>
    %22 = arith.subf %21, %20 : vector<8x256xf32>
    %cst_10 = arith.constant 1.000000e+00 : f32
    %23 = vector.broadcast %cst_10 : f32 to vector<8x256xf32>
    %24 = arith.subf %23, %17 : vector<8x256xf32>
    %25 = arith.mulf %24, %24 : vector<8x256xf32>
    %26 = arith.mulf %25, %22 : vector<8x256xf32>
    %c0_11 = arith.constant 0 : index
    %c0_12 = arith.constant 0 : index
    %27 = vector.load %arg5[%c0_11, %c0_12] : memref<8x256xf32, #tpu.memory_space<vmem>>, vector<8x256xf32>
    %28 = vector.shape_cast %26 : vector<8x256xf32> to vector<1x8x256xf32>
    %cst_13 = arith.constant dense<0.000000e+00> : vector<8x256xf32>
    %29 = vector.multi_reduction <add>, %28, %cst_13 [0] : vector<1x8x256xf32> to vector<8x256xf32>
    %30 = arith.addf %27, %29 : vector<8x256xf32>
    %c0_14 = arith.constant 0 : index
    %c0_15 = arith.constant 0 : index
    %31 = vector.load %arg5[%c0_14, %c0_15] : memref<8x256xf32, #tpu.memory_space<vmem>>, vector<8x256xf32>
    tpu.vector_store %arg5[%c0_14, %c0_15], %30 {strides = array<i32>} : memref<8x256xf32, #tpu.memory_space<vmem>>, vector<8x256xf32>,
    %c0_i32_16 = arith.constant 0 : i32
    %32 = arith.cmpi eq, %arg1, %c0_i32_16 : i32
    %33 = arith.extui %32 : i1 to i32
    %c0_i32_17 = arith.constant 0 : i32
    %34 = arith.cmpi ne, %33, %c0_i32_17 : i32
    scf.if %34 {
      %c0_18 = arith.constant 0 : index
      %c0_19 = arith.constant 0 : index
      %35 = vector.load %arg5[%c0_18, %c0_19] : memref<8x256xf32, #tpu.memory_space<vmem>>, vector<8x256xf32>
      %36 = vector.shape_cast %35 : vector<8x256xf32> to vector<1x8x256xf32>
      %cst_20 = arith.constant dense<0.000000e+00> : vector<1xf32>
      %37 = vector.multi_reduction <add>, %36, %cst_20 [1, 2] : vector<1x8x256xf32> to vector<1xf32>
      %38 = vector.shape_cast %37 : vector<1xf32> to vector<1x1x1xf32>
      %39 = vector.extract %38[0, 0, 0] : f32 from vector<1x1x1xf32>
      %40 = vector.broadcast %39 : f32 to vector<1x8x128xf32>
      %c0_21 = arith.constant 0 : index
      %c0_22 = arith.constant 0 : index
      %c0_23 = arith.constant 0 : index
      %41 = vector.load %arg4[%c0_21, %c0_22, %c0_23] : memref<1x8x128xf32, #tpu.memory_space<vmem>>, vector<1x8x128xf32>
      tpu.vector_store %arg4[%c0_21, %c0_22, %c0_23], %40 {strides = array<i32>} : memref<1x8x128xf32, #tpu.memory_space<vmem>>, vector<1x8x128xf32>,
    } else {
    }
    return
  }
  func.func @transform_0(%arg0: i32, %arg1: i32) -> (i32, i32) {
    %c1_i32 = arith.constant 1 : i32
    %0 = arith.muli %arg0, %c1_i32 : i32
    %1 = arith.addi %0, %arg1 : i32
    %c0_i32 = arith.constant 0 : i32
    %c0_i32_0 = arith.constant 0 : i32
    return %1, %c0_i32 : i32, i32
  }
  func.func @transform_1(%arg0: i32, %arg1: i32) -> (i32, i32) {
    %c1_i32 = arith.constant 1 : i32
    %0 = arith.muli %arg0, %c1_i32 : i32
    %1 = arith.addi %0, %arg1 : i32
    %c0_i32 = arith.constant 0 : i32
    %c0_i32_0 = arith.constant 0 : i32
    return %1, %c0_i32 : i32, i32
  }
  func.func @transform_2(%arg0: i32, %arg1: i32) -> (i32, i32, i32) {
    %c0_i32 = arith.constant 0 : i32
    %c0_i32_0 = arith.constant 0 : i32
    %c0_i32_1 = arith.constant 0 : i32
    return %arg0, %c0_i32, %c0_i32_0 : i32, i32, i32
  }
}

</mosaic_0001>

<bundles_post_ra>
// kernel: tpu_custom_call.1
= control target key start
LH: loop header
LB: loop body
LE: loop exit
PB: predicated region body
PF: predicated region fallthrough
CT: control target
= control target key end

     0   :  { %7 = vsyncpa [#allocation4], 0  ;;  %s241_s0 = inlined_call_operand.hbm [shape: f32[8,256], index: 0, kind: input, shape index: {}]   ;;  %s242_s1 = inlined_call_operand.hbm [shape: f32[8,256], index: 1, kind: input, shape index: {}]   ;;  %s243_s2 = inlined_call_operand.hbm [shape: f32[1,8,128], index: 2, kind: output, shape index: {}]  }
   0x1   :  { %8 = vsyncpa [#allocation7], 0 }
   0x2   :  { %9 = vsyncpa [#allocation5], 0  ;;  %s214_s9 = smov [#allocation3]   ;;  %s215_s11 = smov [#allocation6]  }
   0x3   :  { %s20_s10 = sshll.u32 %s214_s9, 4  ;;  %s34_s12 = sshll.u32 %s215_s11, 4  ;;  %s21_s10 = int_to_ptr.vmem [resolvable:$true] %s20_s10  ;;  %s35_s12 = int_to_ptr.vmem [resolvable:$true] %s34_s12 }
   0x4   :  { %s156_s13 = scalar_lea.vmem %s21_s10, 256  ;;  %p161_p1 = scmp.lt.s32.totalorder %s21_s10, %s21_s10 }
   0x5   :  { %p157_p0 = scmp.ne.s32.totalorder %s21_s10, %s156_s13  ;;  %p162_p2 = scmp.lt.s32.totalorder %s156_s13, %s156_s13 }
   0x7   :  { %p163_p3 = por %p162_p2, %p161_p1 }
   0x9   :  { %p164_p4 = pnand %p163_p3, %p157_p0 }
   0xb   :  { %167 = shalt.err (!%p164_p4)
}
   0xc   :  { %23 = dma.hbm_to_vmem [thread:$0]  %s241_s0, 256, %s21_s10, [#allocation4]  }
   0xd   :  { %s176_s16 = scalar_lea.vmem %s35_s12, 256  ;;  %p181_p6 = scmp.lt.s32.totalorder %s35_s12, %s35_s12 }
   0xe   :  { %p177_p5 = scmp.ne.s32.totalorder %s35_s12, %s176_s16  ;;  %p182_p7 = scmp.lt.s32.totalorder %s176_s16, %s176_s16 }
  0x10   :  { %p183_p8 = por %p182_p7, %p181_p6 }
  0x12   :  { %p184_p9 = pnand %p183_p8, %p177_p5 }
  0x14   :  { %187 = shalt.err (!%p184_p9)
}
  0x15   :  { %37 = dma.hbm_to_vmem [thread:$0]  %s242_s1, 256, %s35_s12, [#allocation7]  }
  0x16   :  { %208 = dma.done.wait [#allocation4], 256  }
  0x17   :  { %209 = vsyncadd [#allocation4], 4294967040 }
  0x18   :  { %210 = dma.done.wait [#allocation7], 256  }
  0x19   :  { %211 = vsyncadd [#allocation7], 4294967040  ;;  %v54_v0 = vld [vmem:[#allocation6] sm:$0xff]  ;;  %v55_v1 = vld [vmem:[#allocation6 + $0x8] sm:$0xff]  ;;  %s216_s0 = smov [#allocation8]  }
  0x1a   :  { %v56_v2 = vmul.f32 2.0, %v54_v0  ;;  %v52_v3 = vld [vmem:[#allocation3] sm:$0xff]  ;;  %v57_v4 = vmul.f32 2.0, %v55_v1  ;;  %v53_v5 = vld [vmem:[#allocation3 + $0x8] sm:$0xff]  ;;  %s119_s1 = sshll.u32 %s216_s0, 4  ;;  %s120_s1 = int_to_ptr.vmem [resolvable:$true] %s119_s1 }
  0x1b   :  { %s188_s20 = scalar_lea.vmem %s120_s1, 128  ;;  %p193_p11 = scmp.lt.s32.totalorder %s120_s1, %s120_s1 }
  0x1c   :  { %v129_v6 = vadd.f32 -1.0, %v56_v2  ;;  %v130_v7 = vadd.f32 -1.0, %v57_v4  ;;  %p189_p10 = scmp.ne.s32.totalorder %s120_s1, %s188_s20  ;;  %p194_p12 = scmp.lt.s32.totalorder %s188_s20, %s188_s20 }
  0x1e   :  { %v60_v8 = vmul.f32 %v129_v6, %v52_v3  ;;  %v61_v9 = vmul.f32 %v130_v7, %v53_v5  ;;  %p195_p13 = por %p194_p12, %p193_p11 }
  0x20   :  { %v62_v10 = vsub.f32 0.0, %v60_v8  ;;  %v63_v11 = vsub.f32 0.0, %v61_v9  ;;  %p196_p0 = pnand %p195_p13, %p189_p10 }
  0x22   :  { %v64_v12 = vmul.f32 1.442695, %v62_v10  ;;  %v66_v13 = vmul.f32 1.442695, %v63_v11 }
  0x24   :  { %136 = vpow2.f32 %v64_v12 }
  0x25   :  { %138 = vpow2.f32 %v66_v13 }
  0x31   :  { %v137_v14 = vpop.eup %136 }
  0x32   :  { %v139_v15 = vpop.eup %138  ;;  %v68_v16 = vmin.f32 %v137_v14, 1e+30 }
  0x33   :  { %v69_v17 = vmin.f32 %v139_v15, 1e+30 }
  0x34   :  { %v70_v18 = vadd.f32 1.0, %v68_v16 }
  0x35   :  { %v71_v19 = vadd.f32 1.0, %v69_v17 }
  0x36   :  { %140 = vrcp.f32 %v70_v18 }
  0x37   :  { %142 = vrcp.f32 %v71_v19 }
  0x43   :  { %v141_v20 = vpop.eup %140 }
  0x44   :  { %v143_v21 = vpop.eup %142  ;;  %v74_v22 = vmax.f32 %v141_v20, 1e-12  ;;  %v82_v24 = vsub.f32 1.0, %v141_v20 }
  0x45   :  { %v75_v23 = vmax.f32 %v143_v21, 1e-12  ;;  %v83_v25 = vsub.f32 1.0, %v143_v21 }
  0x46   :  { %144 = vlog2.f32 %v74_v22  ;;  %v84_v29 = vmul.f32 %v82_v24, %v82_v24 }
  0x47   :  { %146 = vlog2.f32 %v75_v23  ;;  %v85_v31 = vmul.f32 %v83_v25, %v83_v25 }
  0x53   :  { %v145_v26 = vpop.eup %144 }
  0x54   :  { %v147_v27 = vpop.eup %146  ;;  %v77_v28 = vmul.f32 0.6931472, %v145_v26 }
  0x55   :  { %v79_v30 = vmul.f32 0.6931472, %v147_v27 }
  0x56   :  { %v80_v32 = vsub.f32 0.0, %v77_v28 }
  0x57   :  { %v81_v33 = vsub.f32 0.0, %v79_v30 }
  0x58   :  { %v86_v34 = vmul.f32 %v84_v29, %v80_v32 }
  0x59   :  { %v87_v35 = vmul.f32 %v85_v31, %v81_v33 }
  0x5b   :  { %v101_v36 = vadd.f32 %v87_v35, %v86_v34 }
  0x5d   :  { %102 = vadd.xlane.f32.xlu0 %v101_v36 }
  0xe6   :  { %v103_v37 = vpop.xlane.xlu0 %102 }
  0xe7   :  { %v104_v38 = vrot.slane %v103_v37, 4 }
  0xe9   :  { %v105_v39 = vadd.f32 %v104_v38, %v103_v37 }
  0xeb   :  { %v106_v40 = vrot.slane %v105_v39, 2 }
  0xed   :  { %v107_v41 = vadd.f32 %v106_v40, %v105_v39 }
  0xef   :  { %v108_v42 = vrot.slane %v107_v41, 1 }
  0xf1   :  { %v109_v43 = vadd.f32 %v108_v42, %v107_v41 }
  0xf3   :  { %131 = vpush %v109_v43 }
 0x124   :  { %s132_s19 = spop %131 }
 0x125   :  { %v111_v44 = vstv %s132_s19 }
 0x126   :  { %112 = vst [vmem:[#allocation8] sm:$0xff] %v111_v44 }
 0x127   :  { %199 = shalt.err (!%p196_p0)
}
 0x128   :  { %122 = dma.vmem_to_hbm [thread:$0]  %s120_s1, 128, %s243_s2, [#allocation5]  }
 0x129   :  { %212 = dma.done.wait [#allocation5], 128  }
 0x12a   :  { %213 = vsyncadd [#allocation5], 4294967168 }
 0x12b   :  { %126 = vsyncpa [#allocation4], 1 }
 0x12c   :  { %127 = vsyncpa [#allocation7], 1 }
 0x12d   :  { %128 = vsyncpa [#allocation5], 1 }

</bundles_post_ra>
